<compile_context>
chip_gen: v7x
topology: tpu7x:2x2x1
jax: 0.10.0
libtpu: 0.0.40
codegen_flags: <defaults>
</compile_context>

<pallas_src>
import functools

import jax
import jax.numpy as jnp
from jax.experimental import pallas as pl
from jax.experimental.pallas import tpu as pltpu


def _round_up(n, m):
    return ((n + m - 1) // m) * m


def _pad2(a, rows, cols):
    r, c = a.shape
    return jnp.pad(a, ((0, rows - r), (0, cols - c)))


def _pad_last(a, n):
    pad = [(0, 0)] * (a.ndim - 1) + [(0, n - a.shape[-1])]
    return jnp.pad(a, pad)


def _spectral_attention_kernel(
    qb_map_ref,   # (n_steps,) int32 in SMEM  (scalar prefetch)
    kb_map_ref,   # (n_steps,) int32 in SMEM  (scalar prefetch)
    q_ref,        # (1, tile_t, Pp)  Q tile               (compute dtype)
    kd_ref,       # (1, kv_rows, Pp) decay-folded K       (compute dtype)
    v_ref,        # (1, kv_rows, Pp) V                    (compute dtype)
    w_o_ref,      # (Pp, Dp)         output projection    (compute dtype)
    b_o_ref,      # (1, Dp)          output bias (f32)
    o_ref,        # (1, tile_t, Dp)  output (f32)
    acc_scr,      # (tile_t, Pp) f32 accumulator
    *,
    tile_t,
    compute_dtype,
    kv_resident,
):
    s = pl.program_id(1)
    qb = qb_map_ref[s]
    kb = kb_map_ref[s]

    @pl.when(kb == 0)
    def _init():
        acc_scr[...] = jnp.zeros_like(acc_scr)

    if kv_resident:
        # Whole per-batch K_d / V live in VMEM; slice the current key tile.
        start = pl.multiple_of(kb * tile_t, tile_t)
        kd = kd_ref[0, pl.ds(start, tile_t), :]
        v = v_ref[0, pl.ds(start, tile_t), :]
    else:
        kd = kd_ref[0]
        v = v_ref[0]

    # scores[t, s] = Q[t] . V[s]  (contract the feature axis; no transpose).
    scores = jax.lax.dot_general(
        q_ref[0], v,
        dimension_numbers=(((1,), (1,)), ((), ())),
        preferred_element_type=jnp.float32)

    @pl.when(kb < qb)            # fully-causal tile: no mask needed
    def _off_diag():
        acc_scr[...] += jnp.dot(scores.astype(compute_dtype), kd,
                                preferred_element_type=jnp.float32)

    @pl.when(kb == qb)           # diagonal tile: mask, then fused o_proj
    def _diag():
        # qb == kb, so the global row/col offsets cancel: local iotas suffice;
        # the mask is fused with the dtype cast (no extra f32 temporary).
        row = jax.lax.broadcasted_iota(jnp.int32, scores.shape, 0)
        col = jax.lax.broadcasted_iota(jnp.int32, scores.shape, 1)
        p = jnp.where(col <= row, scores, 0.0).astype(compute_dtype)
        acc = acc_scr[...] + jnp.dot(p, kd, preferred_element_type=jnp.float32)
        out = jnp.dot(acc.astype(compute_dtype), w_o_ref[...],
                      preferred_element_type=jnp.float32) + b_o_ref[...]
        o_ref[0] = out.astype(o_ref.dtype)


def spectral_attention(x, params, *, tile_t=None, compute_dtype=jnp.bfloat16,
                       kv_resident=None):
    """x: (B, T, D) float32. params: dict of weights (see init_params)."""
    B, T, D = x.shape
    p = params["q_filt"].shape[0]
    assert params["decay"].shape[-1] == T, "decay length must equal seq_len"

    f32 = jnp.float32
    cd_bytes = jnp.dtype(compute_dtype).itemsize
    # Lane-dense feature dims: full MXU lanes, unmasked vector stores.
    Dp = _round_up(D, 128)
    Pp = _round_up(p, 128)

    # --- tile size (per-generation heuristic) -------------------------------
    sub = 16 if jnp.dtype(compute_dtype) == jnp.dtype(jnp.bfloat16) else 8
    if tile_t is None:
        want = 256
        try:
            kind = jax.devices()[0].device_kind.lower()
        except Exception:
            kind = ""
        if "v5 lite" in kind or "v5e" in kind:
            want = 128            # v5e: 4x128^2 MXU, small scoped VMEM
        cands = [d for d in range(sub, min(want, T) + 1, sub) if T % d == 0]
        tile_t = max(cands) if cands else T
    assert T % tile_t == 0, "tile_t must divide T"
    assert tile_t == T or tile_t % sub == 0, \
        "tile_t must respect sublane packing (8 rows f32 / 16 rows bf16)"
    nt = T // tile_t
    n_steps = nt * (nt + 1) // 2

    # --- hoisted projections: batched XLA GEMMs done ONCE -------------------
    #   (x W_in^T + b_in) F  ==  x (W_in^T F) + (b_in F)
    w_q = params["w_in_t"] @ params["q_filt"]
    b_q = params["b_in"] @ params["q_filt"]
    w_k = params["w_in_t"] @ params["k_filt"]
    b_k = params["b_in"] @ params["k_filt"]
    decay = params["decay"].reshape(T).astype(f32)

    Q = x @ w_q + b_q
    K = x @ w_k + b_k
    V = x @ params["w_v_t"] + params["b_v"]
    Kd = K * decay[None, :, None]            # fold decay into K once (O(T*p))

    Q_p = _pad_last(Q, Pp).astype(compute_dtype)
    Kd_p = _pad_last(Kd, Pp).astype(compute_dtype)
    V_p = _pad_last(V, Pp).astype(compute_dtype)
    w_o_p = _pad2(params["w_o_t"], Pp, Dp).astype(compute_dtype)
    b_o_p = _pad2(params["b_o"], 1, Dp).astype(f32)

    # --- flattened lower-triangular grid (no dead upper-tri steps) ----------
    qb_idx, kb_idx = [], []
    for qi in range(nt):
        for ki in range(qi + 1):
            qb_idx.append(qi)
            kb_idx.append(ki)
    qb_idx = jnp.asarray(qb_idx, jnp.int32)
    kb_idx = jnp.asarray(kb_idx, jnp.int32)

    # --- key-side residency: keep whole per-batch K_d/V in VMEM when it fits
    #     comfortably; removes the O(T^2/tile) repeated key-tile HBM stream.
    if kv_resident is None:
        kv_resident = (nt > 1) and (2 * 2 * T * Pp * cd_bytes) <= 16 * 2**20
    kv_rows = T if kv_resident else tile_t

    q_map = lambda b, s, qm, km: (b, qm[s], 0)
    if kv_resident:
        kv_map = lambda b, s, qm, km: (b, 0, 0)
    else:
        kv_map = lambda b, s, qm, km: (b, km[s], 0)
    const2d = lambda shape: pl.BlockSpec(shape, lambda b, s, qm, km: (0, 0))

    # --- VMEM budget / cost estimate ----------------------------------------
    vmem_bytes = (
        2 * tile_t * Pp * cd_bytes              # Q (double buffered)
        + 2 * 2 * kv_rows * Pp * cd_bytes       # K_d + V
        + 2 * Pp * Dp * cd_bytes                # W_o
        + 2 * 8 * Dp * 4                        # b_o (sublane padded)
        + 2 * tile_t * Dp * 4                   # output tile
        + tile_t * Pp * 4                       # accumulator scratch
        + 4 * tile_t * tile_t * 4               # score intermediates (rough)
    )
    vmem_limit = int(min(64 * 2**20, max(32 * 2**20, 2 * vmem_bytes)))

    flops = 2 * B * (2 * n_steps * tile_t * tile_t * Pp + T * Pp * Dp)
    kv_read = 2 * B * (T if kv_resident else n_steps * tile_t) * Pp * cd_bytes
    bytes_accessed = int(B * T * Pp * cd_bytes       # Q (once per q tile)
                         + kv_read                   # K_d + V
                         + B * T * Dp * 4            # output
                         + Pp * Dp * cd_bytes + Dp * 4)

    kernel = functools.partial(
        _spectral_attention_kernel,
        tile_t=tile_t, compute_dtype=compute_dtype, kv_resident=kv_resident)

    out = pl.pallas_call(
        kernel,
        out_shape=jax.ShapeDtypeStruct((B, T, Dp), jnp.float32),
        grid_spec=pltpu.PrefetchScalarGridSpec(
            num_scalar_prefetch=2,
            grid=(B, n_steps),                        # only lower-tri steps
            in_specs=[
                pl.BlockSpec((1, tile_t, Pp), q_map),      # Q
                pl.BlockSpec((1, kv_rows, Pp), kv_map),    # decay-folded K
                pl.BlockSpec((1, kv_rows, Pp), kv_map),    # V
                const2d((Pp, Dp)),                         # W_o (VMEM-resident)
                const2d((1, Dp)),                          # b_o
            ],
            out_specs=pl.BlockSpec((1, tile_t, Dp), q_map),
            scratch_shapes=[pltpu.VMEM((tile_t, Pp), jnp.float32)],
        ),
        compiler_params=pltpu.CompilerParams(
            dimension_semantics=("parallel", "arbitrary"),   # batch across TCs
            vmem_limit_bytes=vmem_limit),
        cost_estimate=pl.CostEstimate(flops=flops, transcendentals=0,
                                      bytes_accessed=bytes_accessed),
    )(qb_idx, kb_idx, Q_p, Kd_p, V_p, w_o_p, b_o_p)
    return out[..., :D]


def init_params(key, n_embd, proj_dim, seq_len):
    ks = jax.random.split(key, 8)
    scale_in = 1.0 / jnp.sqrt(n_embd)
    scale_out = 1.0 / jnp.sqrt(proj_dim)
    return dict(
        # nn.Linear(n_embd, proj_dim): weight (p, D); we store the transpose.
        w_in_t=(jax.random.normal(ks[0], (n_embd, proj_dim)) * scale_in).astype(jnp.float32),
        b_in=(jax.random.normal(ks[1], (1, proj_dim)) * scale_in).astype(jnp.float32),
        q_filt=jax.random.normal(ks[2], (proj_dim, proj_dim)).astype(jnp.float32),
        k_filt=jax.random.normal(ks[3], (proj_dim, proj_dim)).astype(jnp.float32),
        w_v_t=(jax.random.normal(ks[4], (n_embd, proj_dim)) * scale_in).astype(jnp.float32),
        b_v=(jax.random.normal(ks[5], (1, proj_dim)) * scale_in).astype(jnp.float32),
        w_o_t=(jax.random.normal(ks[6], (proj_dim, n_embd)) * scale_out).astype(jnp.float32),
        b_o=(jax.random.normal(ks[7], (1, n_embd)) * scale_out).astype(jnp.float32),
        decay=jnp.ones((1, seq_len), jnp.float32),   # nn.Parameter(torch.ones(seq_len))
    )


def reference_forward(x, params):
    """Pure-JAX transcription of the PyTorch forward (einsum + cumsum)."""
    x_proj = x @ params["w_in_t"] + params["b_in"][0]
    Q = x_proj @ params["q_filt"]
    K = x_proj @ params["k_filt"]
    V = x @ params["w_v_t"] + params["b_v"][0]
    Z = jnp.einsum("bti,btj->btij", V, K)
    Z = Z * params["decay"][0][None, :, None, None]
    H = jnp.cumsum(Z, axis=1)
    Y = jnp.einsum("bti,btij->btj", Q, H)
    return Y @ params["w_o_t"] + params["b_o"][0]


if __name__ == "__main__":
    def run_case(case_key, B, T, D, P, **kw):
        kx, kp, kd = jax.random.split(case_key, 3)
        x = jax.random.normal(kx, (B, T, D), dtype=jnp.float32)
        params = init_params(kp, n_embd=D, proj_dim=P, seq_len=T)
        # non-trivial decay so the decay-fold path is actually exercised
        params["decay"] = jax.random.uniform(kd, (1, T), minval=0.5, maxval=1.5)
        ref = reference_forward(x, params)
        out = jax.block_until_ready(spectral_attention(x, params, **kw))
        assert out.shape == ref.shape
        scale = float(jnp.maximum(jnp.max(jnp.abs(ref)), 1.0))
        return float(jnp.max(jnp.abs(out - ref))) / scale

    root = jax.random.PRNGKey(0)
    k0, k1 = jax.random.split(root)

    # Small shapes consistent with the module: B=2, T=8, n_embd=32, proj_dim=16.
    assert run_case(k0, 2, 8, 32, 16, compute_dtype=jnp.float32) <= 1e-2, \
        "f32 single-tile mismatch"
    assert run_case(k0, 2, 8, 32, 16) <= 5e-2, "bf16 single-tile mismatch"

    # Multi-tile: flattened triangular grid, diagonal masking, accumulation.
    assert run_case(k1, 2, 64, 32, 16, tile_t=16,
                    compute_dtype=jnp.float32) <= 1e-2, \
        "f32 multi-tile (resident K/V) mismatch"
    assert run_case(k1, 2, 64, 32, 16, tile_t=16) <= 5e-2, \
        "bf16 multi-tile (resident K/V) mismatch"
    assert run_case(k1, 2, 64, 32, 16, tile_t=16, kv_resident=False) <= 5e-2, \
        "bf16 multi-tile (streaming K/V) mismatch"

    print("KERNEL_OK")
</pallas_src>

<mosaic_0001>
module attributes {stable_mosaic.version = 11 : i64} {
  func.func @_spectral_attention_kernel(%arg0: i32, %arg1: i32, %arg2: memref<1xi32, #tpu.memory_space<smem>>, %arg3: memref<1xi32, #tpu.memory_space<smem>>, %arg4: memref<1x8x128xf32, #tpu.memory_space<vmem>>, %arg5: memref<1x8x128xf32, #tpu.memory_space<vmem>>, %arg6: memref<1x8x128xf32, #tpu.memory_space<vmem>>, %arg7: memref<128x128xf32, #tpu.memory_space<vmem>>, %arg8: memref<1x128xf32, #tpu.memory_space<vmem>>, %arg9: memref<1x8x128xf32, #tpu.memory_space<vmem>>, %arg10: memref<8x128xf32, #tpu.memory_space<vmem>>) attributes {dimension_semantics = [#tpu.dimension_semantics<parallel>, #tpu.dimension_semantics<arbitrary>], iteration_bounds = array<i64: 2, 1>, scalar_prefetch = 2 : i64, scratch_operands = 1 : i64, tpu.core_type = #tpu.core_type<tc>, window_params = [{transform_indices = @transform_0, window_bounds = array<i64: 1, 8, 128>}, {transform_indices = @transform_1, window_bounds = array<i64: 1, 8, 128>}, {transform_indices = @transform_2, window_bounds = array<i64: 1, 8, 128>}, {pipeline_mode = #tpu.pipeline_mode<synchronous>, transform_indices = @transform_3, window_bounds = array<i64: 128, 128>}, {pipeline_mode = #tpu.pipeline_mode<synchronous>, transform_indices = @transform_4, window_bounds = array<i64: 1, 128>}, {transform_indices = @transform_5, window_bounds = array<i64: 1, 8, 128>}]} {
    %0 = arith.index_cast %arg1 : i32 to index
    %1 = memref.load %arg2[%0] : memref<1xi32, #tpu.memory_space<smem>>
    %2 = arith.index_cast %arg1 : i32 to index
    %3 = memref.load %arg3[%2] : memref<1xi32, #tpu.memory_space<smem>>
    %c0_i32 = arith.constant 0 : i32
    %4 = arith.cmpi eq, %3, %c0_i32 : i32
    %5 = arith.extui %4 : i1 to i32
    %c0_i32_0 = arith.constant 0 : i32
    %6 = arith.cmpi ne, %5, %c0_i32_0 : i32
    scf.if %6 {
      %cst_11 = arith.constant 0.000000e+00 : f32
      %20 = vector.broadcast %cst_11 : f32 to vector<8x128xf32>
      %c0_12 = arith.constant 0 : index
      %c0_13 = arith.constant 0 : index
      %21 = vector.load %arg10[%c0_12, %c0_13] : memref<8x128xf32, #tpu.memory_space<vmem>>, vector<8x128xf32>
      tpu.vector_store %arg10[%c0_12, %c0_13], %20 {strides = array<i32>} : memref<8x128xf32, #tpu.memory_space<vmem>>, vector<8x128xf32>,
    } else {
    }
    %c0 = arith.constant 0 : index
    %c0_1 = arith.constant 0 : index
    %c0_2 = arith.constant 0 : index
    %7 = vector.load %arg5[%c0, %c0_1, %c0_2] : memref<1x8x128xf32, #tpu.memory_space<vmem>>, vector<1x8x128xf32>
    %8 = vector.shape_cast %7 : vector<1x8x128xf32> to vector<8x128xf32>
    %c0_3 = arith.constant 0 : index
    %c0_4 = arith.constant 0 : index
    %c0_5 = arith.constant 0 : index
    %9 = vector.load %arg6[%c0_3, %c0_4, %c0_5] : memref<1x8x128xf32, #tpu.memory_space<vmem>>, vector<1x8x128xf32>
    %10 = vector.shape_cast %9 : vector<1x8x128xf32> to vector<8x128xf32>
    %c0_6 = arith.constant 0 : index
    %c0_7 = arith.constant 0 : index
    %c0_8 = arith.constant 0 : index
    %11 = vector.load %arg4[%c0_6, %c0_7, %c0_8] : memref<1x8x128xf32, #tpu.memory_space<vmem>>, vector<1x8x128xf32>
    %12 = vector.shape_cast %11 : vector<1x8x128xf32> to vector<8x128xf32>
    %cst = arith.constant dense<0.000000e+00> : vector<8x8xf32>
    %13 = tpu.matmul %12, %10, %cst {dimension_numbers = #tpu.dot_dimension_numbers<[1], [1], [0], [0], [0, 0, 1, 0], [], []>} : vector<8x128xf32>, vector<8x128xf32>, vector<8x8xf32> -> vector<8x8xf32>
    %14 = arith.cmpi slt, %3, %1 : i32
    %15 = arith.extui %14 : i1 to i32
    %c0_i32_9 = arith.constant 0 : i32
    %16 = arith.cmpi ne, %15, %c0_i32_9 : i32
    scf.if %16 {
      %c0_11 = arith.constant 0 : index
      %c0_12 = arith.constant 0 : index
      %20 = vector.load %arg10[%c0_11, %c0_12] : memref<8x128xf32, #tpu.memory_space<vmem>>, vector<8x128xf32>
      %cst_13 = arith.constant dense<0.000000e+00> : vector<8x128xf32>
      %21 = tpu.matmul %13, %8, %cst_13 {dimension_numbers = #tpu.dot_dimension_numbers<[1], [0], [0], [1], [0, 0, 1, 1], [], []>} : vector<8x8xf32>, vector<8x128xf32>, vector<8x128xf32> -> vector<8x128xf32>
      %22 = arith.addf %20, %21 : vector<8x128xf32>
      %c0_14 = arith.constant 0 : index
      %c0_15 = arith.constant 0 : index
      %23 = vector.load %arg10[%c0_14, %c0_15] : memref<8x128xf32, #tpu.memory_space<vmem>>, vector<8x128xf32>
      tpu.vector_store %arg10[%c0_14, %c0_15], %22 {strides = array<i32>} : memref<8x128xf32, #tpu.memory_space<vmem>>, vector<8x128xf32>,
    } else {
    }
    %17 = arith.cmpi eq, %3, %1 : i32
    %18 = arith.extui %17 : i1 to i32
    %c0_i32_10 = arith.constant 0 : i32
    %19 = arith.cmpi ne, %18, %c0_i32_10 : i32
    scf.if %19 {
      %20 = tpu.iota {dimensions = array<i32: 0>} : vector<8x8xi32>
      %21 = tpu.iota {dimensions = array<i32: 1>} : vector<8x8xi32>
      %22 = arith.cmpi sle, %21, %20 : vector<8x8xi32>
      %cst_11 = arith.constant 0.000000e+00 : f32
      %23 = vector.broadcast %cst_11 : f32 to vector<8x8xf32>
      %24 = arith.select %22, %13, %23 : vector<8x8xi1>, vector<8x8xf32>
      %c0_12 = arith.constant 0 : index
      %c0_13 = arith.constant 0 : index
      %25 = vector.load %arg10[%c0_12, %c0_13] : memref<8x128xf32, #tpu.memory_space<vmem>>, vector<8x128xf32>
      %cst_14 = arith.constant dense<0.000000e+00> : vector<8x128xf32>
      %26 = tpu.matmul %24, %8, %cst_14 {dimension_numbers = #tpu.dot_dimension_numbers<[1], [0], [0], [1], [0, 0, 1, 1], [], []>} : vector<8x8xf32>, vector<8x128xf32>, vector<8x128xf32> -> vector<8x128xf32>
      %27 = arith.addf %25, %26 : vector<8x128xf32>
      %c0_15 = arith.constant 0 : index
      %c0_16 = arith.constant 0 : index
      %28 = vector.load %arg7[%c0_15, %c0_16] : memref<128x128xf32, #tpu.memory_space<vmem>>, vector<128x128xf32>
      %cst_17 = arith.constant dense<0.000000e+00> : vector<8x128xf32>
      %29 = tpu.matmul %27, %28, %cst_17 {dimension_numbers = #tpu.dot_dimension_numbers<[1], [0], [0], [1], [0, 0, 1, 1], [], []>} : vector<8x128xf32>, vector<128x128xf32>, vector<8x128xf32> -> vector<8x128xf32>
      %c0_18 = arith.constant 0 : index
      %c0_19 = arith.constant 0 : index
      %30 = vector.load %arg8[%c0_18, %c0_19] : memref<1x128xf32, #tpu.memory_space<vmem>>, vector<1x128xf32>
      %31 = vector.broadcast %30 : vector<1x128xf32> to vector<8x128xf32>
      %32 = arith.addf %29, %31 : vector<8x128xf32>
      %c0_20 = arith.constant 0 : index
      %c0_21 = arith.constant 0 : index
      %c0_22 = arith.constant 0 : index
      %33 = vector.load %arg9[%c0_20, %c0_21, %c0_22] : memref<1x8x128xf32, #tpu.memory_space<vmem>>, vector<1x8x128xf32>
      %34 = vector.shape_cast %33 : vector<1x8x128xf32> to vector<8x128xf32>
      %35 = vector.shape_cast %32 : vector<8x128xf32> to vector<1x8x128xf32>
      tpu.vector_store %arg9[%c0_20, %c0_21, %c0_22], %35 {strides = array<i32>} : memref<1x8x128xf32, #tpu.memory_space<vmem>>, vector<1x8x128xf32>,
    } else {
    }
    return
  }
  func.func @transform_0(%arg0: i32, %arg1: i32, %arg2: memref<1xi32, #tpu.memory_space<smem>>, %arg3: memref<1xi32, #tpu.memory_space<smem>>) -> (i32, i32, i32) {
    %0 = arith.index_cast %arg1 : i32 to index
    %1 = memref.load %arg2[%0] : memref<1xi32, #tpu.memory_space<smem>>
    %c0_i32 = arith.constant 0 : i32
    %c0_i32_0 = arith.constant 0 : i32
    return %arg0, %1, %c0_i32 : i32, i32, i32
  }
  func.func @transform_1(%arg0: i32, %arg1: i32, %arg2: memref<1xi32, #tpu.memory_space<smem>>, %arg3: memref<1xi32, #tpu.memory_space<smem>>) -> (i32, i32, i32) {
    %0 = arith.index_cast %arg1 : i32 to index
    %1 = memref.load %arg3[%0] : memref<1xi32, #tpu.memory_space<smem>>
    %c0_i32 = arith.constant 0 : i32
    %c0_i32_0 = arith.constant 0 : i32
    return %arg0, %1, %c0_i32 : i32, i32, i32
  }
  func.func @transform_2(%arg0: i32, %arg1: i32, %arg2: memref<1xi32, #tpu.memory_space<smem>>, %arg3: memref<1xi32, #tpu.memory_space<smem>>) -> (i32, i32, i32) {
    %0 = arith.index_cast %arg1 : i32 to index
    %1 = memref.load %arg3[%0] : memref<1xi32, #tpu.memory_space<smem>>
    %c0_i32 = arith.constant 0 : i32
    %c0_i32_0 = arith.constant 0 : i32
    return %arg0, %1, %c0_i32 : i32, i32, i32
  }
  func.func @transform_3(%arg0: i32, %arg1: i32, %arg2: memref<1xi32, #tpu.memory_space<smem>>, %arg3: memref<1xi32, #tpu.memory_space<smem>>) -> (i32, i32) {
    %c0_i32 = arith.constant 0 : i32
    %c0_i32_0 = arith.constant 0 : i32
    %c0_i32_1 = arith.constant 0 : i32
    return %c0_i32, %c0_i32_0 : i32, i32
  }
  func.func @transform_4(%arg0: i32, %arg1: i32, %arg2: memref<1xi32, #tpu.memory_space<smem>>, %arg3: memref<1xi32, #tpu.memory_space<smem>>) -> (i32, i32) {
    %c0_i32 = arith.constant 0 : i32
    %c0_i32_0 = arith.constant 0 : i32
    %c0_i32_1 = arith.constant 0 : i32
    return %c0_i32, %c0_i32_0 : i32, i32
  }
  func.func @transform_5(%arg0: i32, %arg1: i32, %arg2: memref<1xi32, #tpu.memory_space<smem>>, %arg3: memref<1xi32, #tpu.memory_space<smem>>) -> (i32, i32, i32) {
    %0 = arith.index_cast %arg1 : i32 to index
    %1 = memref.load %arg2[%0] : memref<1xi32, #tpu.memory_space<smem>>
    %c0_i32 = arith.constant 0 : i32
    %c0_i32_0 = arith.constant 0 : i32
    return %arg0, %1, %c0_i32 : i32, i32, i32
  }
}

</mosaic_0001>

<bundles_post_ra>
// kernel: tpu_custom_call.1
= control target key start
LH: loop header
LB: loop body
LE: loop exit
PB: predicated region body
PF: predicated region fallthrough
CT: control target
= control target key end

     0   :  { %s1952_s0 = inlined_call_operand.<no memory space> [shape: s32[1], index: 0, kind: input, shape index: {}]   ;;  %s1953_s1 = inlined_call_operand.<no memory space> [shape: s32[1], index: 1, kind: input, shape index: {}]   ;;  %s1954_s2 = inlined_call_operand.hbm [shape: f32[2,8,128], index: 2, kind: input, shape index: {}]   ;;  %s1955_s3 = inlined_call_operand.hbm [shape: f32[2,8,128], index: 3, kind: input, shape index: {}]   ;;  %s1956_s4 = inlined_call_operand.hbm [shape: f32[2,8,128], index: 4, kind: input, shape index: {}]   ;;  %s1957_s5 = inlined_call_operand.hbm [shape: f32[128,128], index: 5, kind: input, shape index: {}]   ;;  %s1958_s6 = inlined_call_operand.vmem [shape: f32[1,128], index: 6, kind: input, shape index: {}]   ;;  %s1959_s7 = inlined_call_operand.hbm [shape: f32[2,8,128], index: 7, kind: output, shape index: {}]  }
   0x1   :  { %1982 = sst [smem:[#allocation29_spill]] %s1954_s2 }
   0x2   :  { %1983 = sst [smem:[#allocation30_spill]] %s1955_s3 }
   0x3   :  { %1984 = sst [smem:[#allocation31_spill]] %s1956_s4 }
   0x4   :  { %1985 = sst [smem:[#allocation32_spill]] %s1958_s6 }
   0x5   :  { %1986 = sst [smem:[#allocation33_spill]] %s1959_s7 }
   0x6   :  { %12 = sst [smem:[#allocation4]] %s1952_s0 }
   0x7   :  { %13 = sst [smem:[#allocation5]] %s1953_s1 }
   0x8   :  { %14 = vsyncpa [#allocation7], 0 }
   0x9   :  { %16 = vsyncpa [#allocation7 + $0x1], 0 }
   0xa   :  { %17 = vsyncpa [#allocation10], 0 }
   0xb   :  { %19 = vsyncpa [#allocation10 + $0x1], 0 }
   0xc   :  { %20 = vsyncpa [#allocation13], 0 }
   0xd   :  { %21 = vsyncpa [#allocation8], 0 }
   0xe   :  { %23 = vsyncpa [#allocation8 + $0x1], 0  ;;  %s1496_s28 = smov 0   ;;  %s1498_s29 = smov 0  }
   0xf   :  { %s1500_s30 = smov 0   ;;  %s1502_s8 = smov 0  }
  0x10   :  { %s1504_s0 = smov 0   ;;  %s1506_s9 = smov 0  }
  0x11   :  { %s1508_s1 = smov 0   ;;  %s1510_s10 = smov 0  }
  0x12   :  { %s1512_s11 = smov 0   ;;  %s1514_s12 = smov 0  }
  0x13   :  { %s1516_s13 = smov 0   ;;  %s1518_s14 = smov 0  }
  0x14   :  { %s1520_s15 = smov 0   ;;  %s1522_s16 = smov 0  }
  0x15   :  { %s1524_s17 = smov 0  }
  0x16 LB: > { %1987 = sst [smem:[#allocation20_spill]] %s1377_s28  ;;  %s1570_s18 = sadd.s32 4294967295, %s1433_s17   ;;  %s1433_s17 = sphi %s1524_s17, %s29_s17   ;;  %s1429_s16 = sphi %s1522_s16, %s2057_s16   ;;  %s1425_s15 = sphi %s1520_s15, %s2056_s15   ;;  %s1421_s14 = sphi %s1518_s14, %s2055_s14   ;;  %s1417_s13 = sphi %s1516_s13, %s2054_s13   ;;  %s1413_s12 = sphi %s1514_s12, %s2053_s12   ;;  %s1409_s11 = sphi %s1512_s11, %s2044_s11   ;;  %s1405_s10 = sphi %s1510_s10, %s2052_s10   ;;  %s1401_s1 = sphi %s1508_s1, %s2042_s1   ;;  %s1397_s9 = sphi %s1506_s9, %s2051_s9   ;;  %s1393_s0 = sphi %s1504_s0, %s2050_s0   ;;  %s1389_s8 = sphi %s1502_s8, %s2049_s8   ;;  %s1385_s30 = sphi %s1500_s30, %s2048_s30   ;;  %s1381_s29 = sphi %s1498_s29, %s2047_s29   ;;  %s1377_s28 = sphi %s1496_s28, %s2041_s28  }
  0x17   : > { %1988 = sst [smem:[#allocation21_spill]] %s1381_s29  ;;  %s861_s19 = sadd.s32 4294967294, %s1433_s17  }
  0x18   : > { %1989 = sst [smem:[#allocation22_spill]] %s1405_s10  ;;  %s41_s20 = sadd.s32 1, %s1429_s16 }
  0x19   : > { %1990 = sst [smem:[#allocation23_spill]] %s1409_s11  ;;  %p1971_p0 = scmp.eq.s32.totalorder %s1433_s17, 0 }
  0x1a   : > { %1991 = sst [smem:[#allocation24_spill]] %s1425_s15  ;;  %p43_p1 = scmp.ge.s32.totalorder %s41_s20, 2 }
  0x1b   : > { %p1973_p2 = scmp.eq.s32.totalorder %s1570_s18, 0  ;;  %s75_s21 = sld [smem:[#allocation5]] }
  0x1c   : > { %s82_s22 = sadd.s32 1, %s1409_s11  ;;  %s2059_s20 = smov (%p43_p1, %s41_s20), 0 }
  0x1d   : > { %1992 = sst [smem:[#allocation25_spill]] %s2059_s20  ;;  %p89_p3 = scmp.ne.s32.totalorder %s1409_s11, %s1405_s10 }
  0x1e   : > { %p95_p4 = scmp.ne.s32.totalorder %s1405_s10, %s1401_s1  ;;  %s47_s23 = ssub.s32 %s1429_s16, %s2059_s20 }
  0x1f   : > { %s1584_s24 = sld [smem:[#allocation4]]  ;;  %p1588_p5 = por %p89_p3, %p1971_p0 }
  0x20   : > { %p1594_p6 = por %p95_p4, %p1973_p2  ;;  %s184_s27 = sadd.s32 1, %s1385_s30 }
  0x21   : > { %p194_p7 = scmp.ne.s32.totalorder %s1385_s30, %s1381_s29  ;;  %p195_p8 = scmp.eq.s32.totalorder %s1570_s18, 1 }
  0x22   : > { %s1994_s26 = scalar_select %p1594_p6, 1, 0 }
  0x23   : > { %p200_p9 = scmp.ne.s32.totalorder %s1381_s29, %s1377_s28  ;;  %p1604_p10 = scmp.eq.s32.totalorder %s47_s23, 0 }
  0x24   : > { %1995 = sst [smem:[#allocation26_spill]] %s1994_s26  ;;  %p1608_p11 = por %p195_p8, %p194_p7 }
  0x25   : > { %s1996_s1 = scalar_select %p1604_p10, 1, 0 }
  0x26   : > { %s1997_s20 = scalar_select %p1608_p11, 1, 0 }
  0x27   : > { %p201_p12 = scmp.eq.s32.totalorder %s861_s19, 1  ;;  %p1972_p3 = scmp.lt.s32.totalorder %s1433_s17, 2 }
  0x28   : > { %1998 = sst [smem:[#allocation27_spill]] %s1997_s20  ;;  %s257_s15 = sand.u32 1, %s1433_s17  }
  0x29   : > { %s1615_s7 = scalar_select %p1604_p10, %s1409_s11, %s82_s22  }
  0x2a   : > { %p1617_p13 = por %p201_p12, %p200_p9  ;;  %s259_s6 = sand.u32 1, %s1409_s11  }
  0x2b   : > { %1999 = sst [smem:[#allocation28_spill]] %s1615_s7  ;;  %s867_s20 = sshll.u32 %s259_s6, 3 }
  0x2c   : > { %s2000_s28 = scalar_select %p1617_p13, 1, 0 }
  0x2d   : > { %s1626_s23 = scalar_select %p1604_p10, %s1385_s30, %s184_s27  }
  0x2e   : > { %s266_s29 = sadd.s32 %s1429_s16, %s75_s21  ;;  %s261_s19 = scalar_lea.vmem [#allocation9], %s867_s20 }
  0x2f   : > { %s1631_s26 = sshll.u32 %s266_s29, 7  ;;  %s270_s22 = sshll.u32 %s261_s19, 4  ;;  %s1639_s22 = int_to_ptr.vmem [resolvable:$true] %s270_s22 }
  0x30   : > { %s2001_s3 = sld [smem:[#allocation30_spill]]  ;;  %p1645_p4 = pnand %p1972_p3, %p1588_p5 }
  0x31   : > { %s1651_s29 = scalar_lea.sflag [#allocation10], %s257_s15 }
  0x32   : > { %p1151_p12 = pneg %p1645_p4 }
  0x36   : > { %s1637_s4 = scalar_lea.hbm %s2001_s3, %s1631_s26  ;;  %s1154_s21 = scalar_lea.hbm %s2001_s3, 256 }
  0x37   : > { %s1149_s7 = scalar_lea.hbm %s1637_s4, 128  ;;  %p1155_p5 = scmp.lt.u32.totalorder %s1637_s4, %s2001_s3 }
  0x38   : > { %p1150_p9 = scmp.ne.s32.totalorder %s1637_s4, %s1149_s7  ;;  %p1156_p3 = scmp.lt.u32.totalorder %s1154_s21, %s1149_s7 }
  0x39   : > { %p1158_p7 = scmp.lt.u32.totalorder %s1149_s7, %s1637_s4 }
  0x3a   : > { %p1152_p1 = pnand %p1151_p12, %p1150_p9  ;;  %p1157_p2 = por %p1156_p3, %p1155_p5 }
  0x3c   : > { %p1153_p0 = pneg %p1152_p1  ;;  %p1159_p8 = por %p1158_p7, %p1157_p2 }
  0x3e   : > { %p1160_p13 = pnand %p1159_p8, %p1153_p0 }
  0x40   : > { %1163 = shalt.err (!%p1160_p13)
}
  0x41   : > { %s1164_s15 = scalar_lea.vmem %s1639_s22, 128  ;;  %s1435_s19 = smov [#allocation9]  }
  0x42   : > { %p1165_p1 = scmp.ne.s32.totalorder %s1639_s22, %s1164_s15  ;;  %s1169_s10 = sshll.u32 %s1435_s19, 4  ;;  %s1170_s10 = int_to_ptr.vmem [resolvable:$false] %s1169_s10 }
  0x43   : > { %s1171_s20 = scalar_lea.vmem %s1170_s10, 256  ;;  %p1172_p6 = scmp.lt.s32.totalorder %s1639_s22, %s1170_s10 }
  0x44   : > { %p1167_p9 = pnand %p1165_p1, %p1151_p12  ;;  %p1173_p3 = scmp.lt.s32.totalorder %s1171_s20, %s1164_s15 }
  0x46   : > { %p1168_p11 = pneg %p1167_p9  ;;  %p1174_p5 = por %p1173_p3, %p1172_p6 }
  0x48   : > { %p1175_p2 = pnand %p1174_p5, %p1168_p11 }
  0x4a   : > { %1178 = shalt.err (!%p1175_p2)
}
  0x4b   : > { %1006 = dma.hbm_to_vmem [thread:$0]  (!%p1645_p4), %s1637_s4, 128, %s1639_s22, %s1651_s29  }
  0x4c   : > { %p2003_p0 = scmp.lt.s32.totalorder %s1433_s17, 3  ;;  %p2004_p13 = scmp.ge.s32.totalorder %s1433_s17, 1 }
  0x4d   : > { %s1436_s21 = smov [#allocation12]   ;;  %p2006_p11 = scmp.eq.s32.totalorder %s1570_s18, 0 }
  0x4e   : > { %p1683_p7 = pnand %p2004_p13, %p2003_p0  ;;  %s220_s25 = sshll.u32 %s1436_s21, 4  ;;  %s221_s25 = int_to_ptr.vmem [resolvable:$true] %s220_s25 }
  0x4f   : > { %s1179_s4 = scalar_lea.hbm %s1957_s5, 2048 }
  0x50   : > { %s2005_s7 = scalar_select %p1683_p7, 1, 0 }
  0x51   : > { %p996_p6 = pneg %p1683_p7  ;;  %p1180_p4 = scmp.ne.s32.totalorder %s1957_s5, %s1179_s4 }
  0x52   : > { %p1186_p3 = scmp.lt.u32.totalorder %s1179_s4, %s1957_s5 }
  0x53   : > { %p1691_p8 = pnand %p996_p6, %p2006_p11 }
  0x55   : > { %p1181_p12 = pneg %p1691_p8 }
  0x57   : > { %p1182_p1 = pnand %p1181_p12, %p1180_p4 }
  0x59   : > { %p1183_p9 = pneg %p1182_p1 }
  0x5b   : > { %p1188_p5 = pnand %p1186_p3, %p1183_p9 }
  0x5d   : > { %1191 = shalt.err (!%p1188_p5)
}
  0x5e   : > { %s1192_s21 = scalar_lea.vmem %s221_s25, 2048  ;;  %p1200_p6 = scmp.lt.s32.totalorder %s221_s25, %s221_s25 }
  0x5f   : > { %p1193_p2 = scmp.ne.s32.totalorder %s221_s25, %s1192_s21  ;;  %p1201_p11 = scmp.lt.s32.totalorder %s1192_s21, %s1192_s21 }
  0x61   : > { %p1195_p0 = pnand %p1193_p2, %p1181_p12  ;;  %p1202_p7 = por %p1201_p11, %p1200_p6 }
  0x63   : > { %p1196_p13 = pneg %p1195_p0 }
  0x65   : > { %p1203_p10 = pnand %p1202_p7, %p1196_p13 }
  0x67   : > { %1206 = shalt.err (!%p1203_p10)
}
  0x68   : > { %s1437_s27 = smov 128   ;;  %s1438_s15 = smov 8  }
  0x69   : > { %999 = dma.hbm_to_vmem [thread:$0]  (!%p1691_p8), %s1957_s5, 2048, %s221_s25, [#allocation13], %s1437_s27, %s1437_s27, %s1438_s15  }
  0x6a   : > { %s52_s19 = sadd.s32 1, %s1421_s14  ;;  %p2008_p10 = scmp.ne.s32.totalorder %s1996_s1, 0 }
  0x6b   : > { %p59_p7 = scmp.ne.s32.totalorder %s1421_s14, %s1417_s13  ;;  %p65_p4 = scmp.ne.s32.totalorder %s1417_s13, %s1413_s12 }
  0x6c   : > { %s1715_s10 = scalar_select %p2008_p10, %s1421_s14, %s52_s19  }
  0x6d   : > { %s237_s20 = sand.u32 1, %s1421_s14   ;;  %s246_s21 = sadd.s32 %s1429_s16, %s1584_s24 }
  0x6e   : > { %p2009_p12 = scmp.eq.s32.totalorder %s1433_s17, 0  ;;  %p2010_p9 = scmp.eq.s32.totalorder %s1570_s18, 0 }
  0x6f   : > { %s865_s6 = sshll.u32 %s237_s20, 3  ;;  %s866_s11 = sshll.u32 %s246_s21, 7 }
  0x70   : > { %p61_p1 = por %p2009_p12, %p59_p7  ;;  %p1728_p3 = por %p2010_p9, %p65_p4 }
  0x71   : > { %s2012_s2 = sld [smem:[#allocation29_spill]]  ;;  %s241_s12 = scalar_lea.vmem [#allocation6], %s865_s6 }
  0x72   : > { %s2011_s3 = scalar_select %p1728_p3, 1, 0 }
  0x73   : > { %s250_s24 = sshll.u32 %s241_s12, 4  ;;  %p2013_p8 = scmp.lt.s32.totalorder %s1433_s17, 2  ;;  %s1737_s24 = int_to_ptr.vmem [resolvable:$true] %s250_s24 }
  0x74   : > { %s238_s15 = scalar_lea.sflag [#allocation7], %s237_s20 }
  0x75   : > { %p1741_p5 = pnand %p2013_p8, %p61_p1 }
  0x77   : > { %s1735_s25 = scalar_lea.hbm %s2012_s2, %s866_s11  ;;  %p1209_p0 = pneg %p1741_p5 }
  0x78   : > { %s1207_s19 = scalar_lea.hbm %s1735_s25, 128  ;;  %s1212_s6 = scalar_lea.hbm %s2012_s2, 256 }
  0x79   : > { %p1208_p2 = scmp.ne.s32.totalorder %s1735_s25, %s1207_s19  ;;  %p1213_p11 = scmp.lt.u32.totalorder %s1735_s25, %s2012_s2 }
  0x7a   : > { %p1214_p7 = scmp.lt.u32.totalorder %s1212_s6, %s1207_s19  ;;  %p1216_p12 = scmp.lt.u32.totalorder %s1207_s19, %s1735_s25 }
  0x7b   : > { %p1210_p13 = pnand %p1209_p0, %p1208_p2 }
  0x7c   : > { %p1215_p4 = por %p1214_p7, %p1213_p11 }
  0x7d   : > { %p1211_p6 = pneg %p1210_p13 }
  0x7e   : > { %p1217_p1 = por %p1216_p12, %p1215_p4 }
  0x80   : > { %p1218_p9 = pnand %p1217_p1, %p1211_p6 }
  0x82   : > { %1221 = shalt.err (!%p1218_p9)
}
  0x83   : > { %s1222_s20 = scalar_lea.vmem %s1737_s24, 128  ;;  %s1439_s12 = smov [#allocation6]  }
  0x84   : > { %p1223_p8 = scmp.ne.s32.totalorder %s1737_s24, %s1222_s20  ;;  %s1227_s11 = sshll.u32 %s1439_s12, 4  ;;  %s1228_s11 = int_to_ptr.vmem [resolvable:$false] %s1227_s11 }
  0x85   : > { %s1229_s21 = scalar_lea.vmem %s1228_s11, 256  ;;  %p1230_p3 = scmp.lt.s32.totalorder %s1737_s24, %s1228_s11 }
  0x86   : > { %p1225_p2 = pnand %p1223_p8, %p1209_p0  ;;  %p1231_p11 = scmp.lt.s32.totalorder %s1229_s21, %s1222_s20 }
  0x88   : > { %p1226_p13 = pneg %p1225_p2  ;;  %p1232_p7 = por %p1231_p11, %p1230_p3 }
  0x8a   : > { %p1233_p4 = pnand %p1232_p7, %p1226_p13 }
  0x8c   : > { %1236 = shalt.err (!%p1233_p4)
}
  0x8d   : > { %1003 = dma.hbm_to_vmem [thread:$0]  (!%p1741_p5), %s1735_s25, 128, %s1737_s24, %s238_s15  }
  0x8e   : > { %s112_s19 = sadd.s32 1, %s1397_s9  ;;  %p119_p3 = scmp.ne.s32.totalorder %s1397_s9, %s1393_s0 }
  0x8f   : > { %s1774_s6 = scalar_select %p2008_p10, %s1397_s9, %s112_s19  }
  0x90   : > { %p125_p0 = scmp.ne.s32.totalorder %s1393_s0, %s1389_s8  ;;  %s279_s27 = sand.u32 1, %s1397_s9  }
  0x91   : > { %p2015_p6 = scmp.eq.s32.totalorder %s1433_s17, 0  ;;  %p2016_p1 = scmp.eq.s32.totalorder %s1570_s18, 0 }
  0x92   : > { %s869_s22 = sshll.u32 %s279_s27, 3  ;;  %s2018_s11 = sld [smem:[#allocation31_spill]] }
  0x93   : > { %p121_p12 = por %p119_p3, %p2015_p6  ;;  %p1785_p9 = por %p125_p0, %p2016_p1 }
  0x94   : > { %p2020_p5 = scmp.lt.s32.totalorder %s1433_s17, 2  ;;  %s281_s1 = scalar_lea.vmem [#allocation11], %s869_s22 }
  0x95   : > { %s2017_s4 = scalar_select %p1785_p9, 1, 0 }
  0x96   : > { %p1797_p10 = pnand %p2020_p5, %p121_p12  ;;  %s290_s25 = sshll.u32 %s281_s1, 4  ;;  %s291_s25 = int_to_ptr.vmem [resolvable:$true] %s290_s25 }
  0x98   : > { %s2019_s21 = smov %s2018_s11  ;;  %s1793_s2 = scalar_lea.hbm %s2018_s11, %s1631_s26 }
  0x99   : > { %s1237_s24 = scalar_lea.hbm %s1793_s2, 128  ;;  %p1239_p2 = pneg %p1797_p10 }
  0x9a   : > { %p1238_p8 = scmp.ne.s32.totalorder %s1793_s2, %s1237_s24  ;;  %s1242_s19 = scalar_lea.hbm %s2019_s21, 256 }
  0x9b   : > { %p1243_p7 = scmp.lt.u32.totalorder %s1793_s2, %s2019_s21  ;;  %p1244_p4 = scmp.lt.u32.totalorder %s1242_s19, %s1237_s24 }
  0x9c   : > { %p1240_p13 = pnand %p1239_p2, %p1238_p8  ;;  %p1246_p0 = scmp.lt.u32.totalorder %s1237_s24, %s1793_s2 }
  0x9d   : > { %p1245_p3 = por %p1244_p4, %p1243_p7 }
  0x9e   : > { %p1241_p11 = pneg %p1240_p13 }
  0x9f   : > { %p1247_p6 = por %p1246_p0, %p1245_p3 }
  0xa1   : > { %p1248_p12 = pnand %p1247_p6, %p1241_p11 }
  0xa3   : > { %1251 = shalt.err (!%p1248_p12)
}
  0xa4   : > { %s1252_s22 = scalar_lea.vmem %s291_s25, 128  ;;  %s1440_s12 = smov [#allocation11]  }
  0xa5   : > { %p1253_p1 = scmp.ne.s32.totalorder %s291_s25, %s1252_s22  ;;  %s1257_s11 = sshll.u32 %s1440_s12, 4  ;;  %s1258_s11 = int_to_ptr.vmem [resolvable:$false] %s1257_s11 }
  0xa6   : > { %s1259_s1 = scalar_lea.vmem %s1258_s11, 256  ;;  %p1260_p13 = scmp.lt.s32.totalorder %s291_s25, %s1258_s11 }
  0xa7   : > { %p1255_p5 = pnand %p1253_p1, %p1239_p2  ;;  %p1261_p9 = scmp.lt.s32.totalorder %s1259_s1, %s1252_s22 }
  0xa9   : > { %p1256_p8 = pneg %p1255_p5  ;;  %p1262_p4 = por %p1261_p9, %p1260_p13 }
  0xab   : > { %p1263_p7 = pnand %p1262_p4, %p1256_p8 }
  0xad   : > { %1266 = shalt.err (!%p1263_p7)
}
  0xae   : > { %1009 = dma.hbm_to_vmem [thread:$0]  (!%p1797_p10), %s1793_s2, 128, %s291_s25, %s1651_s29  }
  0xaf   : > { %p2022_p11 = scmp.ne.s32.totalorder %s2005_s7, 0 }
  0xb0   : > { %s301_s24 = sand.u32 (!%p2022_p11), 1, %s1417_s13   ;;  %p2023_p2 = scmp.ne.s32.totalorder (!%p2022_p11), %s2011_s3, 0 }
  0xb1   : > { %299 = sbr.rel (%p2022_p11) target bundleno = 1114 (0x45a), region = 40  ;;  %s1826_s26 = sshll.u32 (!%p2022_p11), %s301_s24, 3 }
  0xb2   : > { %s302_s15 = scalar_lea.sflag (!%p2022_p11), [#allocation7], %s301_s24  ;;  %s305_s19 = scalar_lea.vmem (!%p2022_p11), [#allocation6], %s1826_s26 }
  0xb8   : > { %1356 = dma.done.wait (%p2023_p2), %s302_s15, 128  }
  0xb9   : > { %1358 = vsyncadd (%p2023_p2), %s302_s15, 4294967168  ;;  %s2024_s8 = sld [smem:[#allocation22_spill]]  ;;  %s2025_s27 = sld [smem:[#allocation26_spill]] }
  0xba   : > { %s310_s2 = sand.u32 1, %s1570_s18  }
  0xbb   : > { %s311_s25 = scalar_lea.sflag [#allocation10], %s310_s2 }
  0xbf   : > { %s312_s29 = sand.u32 1, %s2024_s8   ;;  %p2026_p9 = scmp.ne.s32.totalorder %s2025_s27, 0 }
  0xc0   : > { %s873_s7 = sshll.u32 %s312_s29, 3 }
  0xc1   : > { %s314_s20 = scalar_lea.vmem [#allocation9], %s873_s7 }
  0xc2   : > { %1360 = dma.done.wait (%p2026_p9), %s311_s25, 128  }
  0xc3   : > { %1362 = vsyncadd (%p2026_p9), %s311_s25, 4294967168  ;;  %s321_s22 = sand.u32 1, %s1393_s0   ;;  %p2027_p10 = scmp.ne.s32.totalorder %s2017_s4, 0 }
  0xc4   : > { %s874_s12 = sshll.u32 %s321_s22, 3 }
  0xc5   : > { %s323_s11 = scalar_lea.vmem [#allocation11], %s874_s12 }
  0xc6   : > { %1364 = dma.done.wait (%p2027_p10), %s311_s25, 128  }
  0xc7   : > { %1366 = vsyncadd (%p2027_p10), %s311_s25, 4294967168  ;;  %p2028_p3 = scmp.eq.s32.totalorder %s1570_s18, 0 }
  0xc9   : > { %1368 = dma.done.wait (%p2028_p3), [#allocation13], 2048   ;;  %p2029_p0 = pmov %p2028_p3 }
  0xca   : > { %s2030_s3 = sld [smem:[#allocation21_spill]]  ;;  %s1849_s24 = sld [smem:[#allocation4]] }
  0xcb   : > { %1370 = vsyncadd (%p2029_p0), [#allocation13], 4294965248  ;;  %s1851_s15 = sld [smem:[#allocation5]] }
  0xd0   : > { %s361_s1 = sand.u32 1, %s2030_s3  }
  0xd1   : > { %s1855_s8 = sshll.u32 %s361_s1, 3  ;;  %p877_p6 = scmp.ne.s32.totalorder %s1851_s15, 0 }
  0xd2   : > { %s363_s27 = scalar_lea.vmem [#allocation14], %s1855_s8  ;;  %v1441_v0 = vmov (!%p877_p6), 0.0  }
  0xd3   : > { %373 = sbr.rel (%p877_p6) target bundleno = 218 (0xda), region = 60  ;;  %374 = vst [vmem:[#allocation2] sm:$0xff] (!%p877_p6), %v1441_v0 }
  0xda PF: > { %v375_v1 = vld [vmem:[%s314_s20] sm:$0xff]  ;;  %v376_v2 = vld [vmem:[%s323_s11] sm:$0xff]  ;;  %v1442_v3 = vmov 0.0   ;;  %vm1443_vm0 = vmmov 0   ;;  %p878_p12 = scmp.ge.s32.totalorder %s1851_s15, %s1849_s24 }
  0xdb   : > { %910 = vmatprep.subr.mxu0 %v1442_v3  ;;  %912 = vmatprep.mubr.msk.f32.mxu0 %vm1443_vm0, %v1442_v3  ;;  %v377_v4 = vld [vmem:[%s305_s19] sm:$0xff]  ;;  %vm453_vm1 = vcmask (!%p878_p12), 64512   ;;  %v1444_v7 = vmov (!%p878_p12), 0.0   ;;  %vm1445_vm2 = vmmov (!%p878_p12), 0   ;;  %v452_v8 = vld [vmem:[#allocation2] sm:$0xff] (!%p878_p12) }
  0xdc   : > { %911 = vmatpush3.xpose.msra.mxu0 %v376_v2 }
  0xdd   : > { %915 = vmatprep.subr.mxu0 (!%p878_p12), %v1444_v7 }
  0xdf   : > { %913 = vmatmul.mubr.f32.vlgmr.msra.gmra.mrb[0].mxu0 %v377_v4 }
  0xe0   : > { %917 = vmatprep.mubr.msk.f32.mxu0 (!%p878_p12), %vm1445_vm2, %v1444_v7  ;;  %916 = vmatpush3.msra.mxu0 (!%p878_p12), %v375_v1 }
 0x1ad   : > { %451 = sbr.rel (%p878_p12) target bundleno = 650 (0x28a), region = 64 }
 0x1b2   : > { %v444_v5 = vpop.f32.mrb[0].mxu0 }
 0x1b3   : > { %v914_v6 = vpop.f32.mrb[1].mxu0  ;;  %918 = vmatmul.mubr.msk.f32.vlgmr.msra.gmra.mrb[0].mxu0 (!%p878_p12), %vm453_vm1, %v444_v5 }
 0x286   : > { %v523_v9 = vpop.f32.mrb[0].mxu0 }
 0x287   : > { %v527_v10 = vadd.f32 %v523_v9, %v452_v8  ;;  %v919_v11 = vpop.f32.mrb[1].mxu0 }
 0x289   : > { %528 = vst [vmem:[#allocation2] sm:$0xff] %v527_v10 }
 0x28a PF: > { %p880_p1 = scmp.ne.s32.totalorder %s1851_s15, %s1849_s24 }
 0x28b   : > { %v533_v12 = vlaneseq (!%p880_p1)  ;;  %v615_v13 = vld [vmem:[#allocation12] sm:$0xff] (!%p880_p1)  ;;  %v616_v14 = vld [vmem:[#allocation12 + $0x8] sm:$0xff] (!%p880_p1)  ;;  %v617_v15 = vld [vmem:[#allocation12 + $0x10] sm:$0xff] (!%p880_p1)  ;;  %v1446_v16 = vmov (!%p880_p1), 0.0   ;;  %vm1447_vm3 = vmmov (!%p880_p1), 0   ;;  %v1448_v21 = vmov (!%p880_p1), 0.0|0.0  }
 0x28c   : > { %532 = sbr.rel (%p880_p1) target bundleno = 1086 (0x43e), region = 68  ;;  %920 = vmatprep.subr.mxu0 (!%p880_p1), %v1446_v16  ;;  %922 = vmatprep.mubr.msk.f32.mxu0 (!%p880_p1), %vm1447_vm3, %v1446_v16  ;;  %v961_v17 = vpack.c.bf16 (!%p880_p1), %v616_v14, %v615_v13  ;;  %v618_v18 = vld [vmem:[#allocation12 + $0x18] sm:$0xff] (!%p880_p1)  ;;  %vm540_vm4 = vcmask (!%p880_p1), 64512   ;;  %v619_v23 = vld [vmem:[#allocation12 + $0x20] sm:$0xff] (!%p880_p1)  ;;  %v620_v24 = vld [vmem:[#allocation12 + $0x28] sm:$0xff] (!%p880_p1)  ;;  %s2031_s26 = sld [smem:[#allocation32_spill]] (!%p880_p1) }
 0x28d   : > { %921 = vmatpush3.msra.mxu0 (!%p880_p1), %v375_v1  ;;  %v534_v19 = vshrl.u32 (!%p880_p1), %v533_v12, 7  ;;  %v536_v20 = vand.u32 (!%p880_p1), 127, %v533_v12  ;;  %960 = vmatprep.subr.bf16.mxu1 (!%p880_p1), %v1448_v21  ;;  %v964_v22 = vpack.c.bf16 (!%p880_p1), %v618_v18, %v617_v15  ;;  %v967_v26 = vpack.c.bf16 (!%p880_p1), %v620_v24, %v619_v23  ;;  %v621_v27 = vld [vmem:[#allocation12 + $0x30] sm:$0xff] (!%p880_p1)  ;;  %v622_v28 = vld [vmem:[#allocation12 + $0x38] sm:$0xff] (!%p880_p1)  ;;  %v623_v30 = vld [vmem:[#allocation12 + $0x40] sm:$0xff] (!%p880_p1) }
 0x28e   : > { %962 = vmatpush3.bf16.msra.mxu1 (!%p880_p1), %v961_v17  ;;  %957 = vmatprep.mubr.msk.f32.mxu1 (!%p880_p1), %vm1447_vm3, %v1446_v16  ;;  %v970_v29 = vpack.c.bf16 (!%p880_p1), %v622_v28, %v621_v27  ;;  %v624_v31 = vld [vmem:[#allocation12 + $0x48] sm:$0xff] (!%p880_p1)  ;;  %v625_v33 = vld [vmem:[#allocation12 + $0x50] sm:$0xff] (!%p880_p1)  ;;  %v626_v34 = vld [vmem:[#allocation12 + $0x58] sm:$0xff] (!%p880_p1) }
 0x28f   : > { %vm537_vm5 = vcmp.le.s32.totalorder (!%p880_p1), %v536_v20, %v534_v19  ;;  %963 = vmatprep.subr.bf16.mxu1 (!%p880_p1), %v1448_v21  ;;  %v973_v32 = vpack.c.bf16 (!%p880_p1), %v624_v31, %v623_v30  ;;  %v976_v35 = vpack.c.bf16 (!%p880_p1), %v626_v34, %v625_v33  ;;  %v627_v36 = vld [vmem:[#allocation12 + $0x60] sm:$0xff] (!%p880_p1)  ;;  %v628_v37 = vld [vmem:[#allocation12 + $0x68] sm:$0xff] (!%p880_p1)  ;;  %v629_v39 = vld [vmem:[#allocation12 + $0x70] sm:$0xff] (!%p880_p1) }
 0x290   : > { %v538_v25 = vsel (!%p880_p1), %vm537_vm5, %v444_v5, 0.0  ;;  %v979_v38 = vpack.c.bf16 (!%p880_p1), %v628_v37, %v627_v36  ;;  %v630_v40 = vld [vmem:[#allocation12 + $0x78] sm:$0xff] (!%p880_p1)  ;;  %v539_v42 = vld [vmem:[#allocation2] sm:$0xff] (!%p880_p1) }
 0x291   : > { %923 = vmatmul.mubr.msk.f32.vlgmr.msra.gmra.mrb[0].mxu0 (!%p880_p1), %vm540_vm4, %v538_v25  ;;  %v982_v41 = vpack.c.bf16 (!%p880_p1), %v630_v40, %v629_v39 }
 0x292   : > { %965 = vmatpush3.bf16.msra.mxu1 (!%p880_p1), %v964_v22  ;;  %v882_v46 = vld [vmem:[%s2031_s26] ss:$0 sm:$0xff] (!%p880_p1) }
 0x293   : > { %966 = vmatprep.subr.bf16.mxu1 %v1448_v21 }
 0x296   : > { %968 = vmatpush3.bf16.msra.mxu1 %v967_v26 }
 0x297   : > { %969 = vmatprep.subr.bf16.mxu1 %v1448_v21 }
 0x29a   : > { %971 = vmatpush3.bf16.msra.mxu1 %v970_v29 }
 0x29b   : > { %972 = vmatprep.subr.bf16.mxu1 %v1448_v21 }
 0x29e   : > { %974 = vmatpush3.bf16.msra.mxu1 %v973_v32 }
 0x29f   : > { %975 = vmatprep.subr.bf16.mxu1 %v1448_v21 }
 0x2a2   : > { %977 = vmatpush3.bf16.msra.mxu1 %v976_v35 }
 0x2a3   : > { %978 = vmatprep.subr.bf16.mxu1 %v1448_v21 }
 0x2a6   : > { %980 = vmatpush3.bf16.msra.mxu1 %v979_v38 }
 0x2a7   : > { %981 = vmatprep.subr.bf16.mxu1 %v1448_v21 }
 0x2aa   : > { %983 = vmatpush3.bf16.msra.mxu1 %v982_v41 }
 0x364   : > { %v610_v43 = vpop.f32.mrb[0].mxu0 }
 0x365   : > { %v614_v44 = vadd.f32 %v610_v43, %v539_v42  ;;  %v924_v45 = vpop.f32.mrb[1].mxu0 }
 0x367   : > { %958 = vmatmul.mubr.f32.vlgmr.msra.gmra.mrb[0].mxu1 %v614_v44 }
 0x43a   : > { %v704_v47 = vpop.f32.mrb[0].mxu1 }
 0x43b   : > { %v705_v48 = vadd.f32 %v882_v46, %v704_v47  ;;  %v959_v49 = vpop.f32.mrb[1].mxu1 }
 0x43d   : > { %708 = vst [vmem:[%s363_s27] sm:$0xff] %v705_v48 }
 0x43e PF: > { %s717_s19 = sld [smem:[#allocation4]]  ;;  %s2032_s2 = sld [smem:[#allocation24_spill]] }
 0x43f   : > { %s2034_s7 = sld [smem:[#allocation27_spill]]  ;;  %s725_s25 = sshll.u32 %s363_s27, 4  ;;  %s1873_s25 = int_to_ptr.vmem [resolvable:$true] %s725_s25 }
 0x440   : > { %s2035_s3 = sld [smem:[#allocation33_spill]]  ;;  %s710_s15 = scalar_lea.sflag [#allocation8], %s361_s1 }
 0x441   : > { %s1267_s18 = scalar_lea.vmem %s1873_s25, 128  ;;  %s1449_s8 = smov [#allocation14]  }
 0x442   : > { %p1268_p5 = scmp.ne.s32.totalorder %s1873_s25, %s1267_s18  ;;  %s1271_s27 = sshll.u32 %s1449_s8, 4  ;;  %s1272_s27 = int_to_ptr.vmem [resolvable:$false] %s1271_s27 }
 0x443   : > { %s1273_s4 = scalar_lea.vmem %s1272_s27, 256  ;;  %p1274_p7 = scmp.lt.s32.totalorder %s1873_s25, %s1272_s27 }
 0x444   : > { %s721_s20 = sadd.s32 %s2032_s2, %s717_s19  ;;  %p1275_p11 = scmp.lt.s32.totalorder %s1273_s4, %s1267_s18 }
 0x445   : > { %s884_s22 = sshll.u32 %s721_s20, 7  ;;  %p2036_p8 = scmp.ne.s32.totalorder %s2034_s7, 0 }
 0x446   : > { %s723_s24 = scalar_lea.hbm %s2035_s3, %s884_s22  ;;  %p1276_p2 = por %p1275_p11, %p1274_p7 }
 0x447   : > { %p1269_p13 = pnand %p1268_p5, %p2036_p8 }
 0x449   : > { %p1270_p4 = pneg %p1269_p13 }
 0x44b   : > { %p1277_p9 = pnand %p1276_p2, %p1270_p4 }
 0x44d   : > { %1280 = shalt.err (!%p1277_p9)
}
 0x44e   : > { %s1281_s26 = scalar_lea.hbm %s723_s24, 128  ;;  %s1285_s2 = scalar_lea.hbm %s2035_s3, 256 }
 0x44f   : > { %p1282_p10 = scmp.ne.s32.totalorder %s723_s24, %s1281_s26  ;;  %p1286_p6 = scmp.lt.u32.totalorder %s723_s24, %s2035_s3 }
 0x450   : > { %p1287_p12 = scmp.lt.u32.totalorder %s1285_s2, %s1281_s26  ;;  %p1289_p5 = scmp.lt.u32.totalorder %s1281_s26, %s723_s24 }
 0x451   : > { %p1283_p3 = pnand %p1282_p10, %p2036_p8 }
 0x452   : > { %p1288_p1 = por %p1287_p12, %p1286_p6 }
 0x453   : > { %p1284_p0 = pneg %p1283_p3 }
 0x454   : > { %p1290_p13 = por %p1289_p5, %p1288_p1 }
 0x456   : > { %p1291_p4 = pnand %p1290_p13, %p1284_p0 }
 0x458   : > { %1294 = shalt.err (!%p1291_p4)
}
 0x459   : > { %994 = dma.vmem_to_hbm [thread:$0]  (%p2036_p8), %s1873_s25, 128, %s723_s24, %s710_s15  }
 0x45a PF: > { %s2037_s22 = sld [smem:[#allocation20_spill]]  ;;  %p2038_p7 = scmp.ne.s32.totalorder %s2000_s28, 0 }
 0x45b   : > { %p2039_p11 = scmp.ge.s32.totalorder %s1433_s17, 2 }
 0x45d   : > { %p1011_p2 = pnand %p2039_p11, %p2038_p7 }
 0x460   : > { %s737_s12 = sand.u32 1, %s2037_s22  }
 0x461   : > { %s738_s11 = scalar_lea.sflag [#allocation8], %s737_s12 }
 0x462   : > { %1372 = dma.done.wait (!%p1011_p2), %s738_s11, 128  }
 0x463   : > { %1374 = vsyncadd (!%p1011_p2), %s738_s11, 4294967168  ;;  %s29_s17 = sadd.s32 1, %s1433_s17   ;;  %s2041_s28 = sld [smem:[#allocation21_spill]] }
 0x464   : > { %p1902_p9 = scmp.ge.s32.totalorder %s29_s17, 4   ;;  %s2042_s1 = sld [smem:[#allocation22_spill]] }
 0x465   : > { %s2043_s7 = sld [smem:[#allocation23_spill]]  ;;  %s2044_s11 = sld [smem:[#allocation28_spill]] }
 0x466   : > { %s2045_s25 = smov %s1715_s10  ;;  %s2046_s24 = sld [smem:[#allocation25_spill]] }
 0x467   : > { %s2047_s29 = smov %s1385_s30  ;;  %s2048_s30 = smov %s1626_s23 }
 0x468   : > { %s2049_s8 = smov %s1393_s0  ;;  %s2050_s0 = smov %s1397_s9 }
 0x469   : > { %s2051_s9 = smov %s1774_s6  ;;  %s2053_s12 = smov %s1417_s13 }
 0x46a   : > { %s2054_s13 = smov %s1421_s14  ;;  %s2055_s14 = smov %s2045_s25 }
 0x46b   : > { %s2052_s10 = smov %s2043_s7  ;;  %s2056_s15 = smov %s1429_s16 }
 0x46c   : > { %s2057_s16 = smov %s2046_s24  ;;  %28 = sbr.rel (!%p1902_p9) target bundleno = 22 (0x16), region = 125 }
 0x473   :  { %743 = vsyncpa [#allocation7], 1 }
 0x474   :  { %745 = vsyncpa [#allocation7 + $0x1], 1 }
 0x475   :  { %746 = vsyncpa [#allocation10], 1 }
 0x476   :  { %748 = vsyncpa [#allocation10 + $0x1], 1 }
 0x477   :  { %749 = vsyncpa [#allocation13], 1 }
 0x478   :  { %750 = vsyncpa [#allocation8], 1 }
 0x479   :  { %752 = vsyncpa [#allocation8 + $0x1], 1 }

</bundles_post_ra>
